<compile_context>
chip_gen: v7x
topology: tpu7x:2x2x1
jax: 0.10.0
libtpu: 0.0.40
codegen_flags: <defaults>
</compile_context>

<pallas_src>
import jax
import jax.numpy as jnp
from jax.experimental import pallas as pl
from jax.experimental.pallas import tpu as pltpu


def _scale_kernel(scale_ref, x_ref, o_ref):
    # scale_ref: SMEM (1,) float32 learnable scalar
    # x_ref / o_ref: VMEM tiles (1-D or 2-D), same shape & dtype
    # Multiply in the tile's native dtype: exact for f32, avoids promoting
    # the whole tile to f32 for bf16/f16 inputs on v6e/v7x.
    o_ref[...] = x_ref[...] * scale_ref[0].astype(x_ref.dtype)


def _device_budget():
    """Per-generation (target_block_bytes_per_buffer, vmem_limit_bytes|None).

    Double-buffered in + out => ~4x target_block_bytes live in VMEM.
    """
    kind = ""
    try:
        kind = jax.devices()[0].device_kind.lower()
    except Exception:
        pass
    if "v7" in kind or "7x" in kind:
        # 64 MiB physical VMEM/TC: 5 MiB/buffer -> ~20 MiB live, 40 MiB limit.
        return 5 * 1024 * 1024, 40 * 1024 * 1024
    if "v6" in kind:
        # 128 MiB physical: 6 MiB/buffer -> ~24 MiB live, 48 MiB limit.
        return 6 * 1024 * 1024, 48 * 1024 * 1024
    if "v5" in kind:
        # 16 MiB scoped-VMEM default: 3 MiB/buffer -> ~12 MiB live, no bump.
        return 3 * 1024 * 1024, None
    # Unknown backend: conservative default.
    return 2 * 1024 * 1024, None


def _compiler_params(vmem_limit_bytes):
    kwargs = dict(dimension_semantics=("parallel",))
    if vmem_limit_bytes is not None:
        kwargs["vmem_limit_bytes"] = int(vmem_limit_bytes)
    # TODO(synk): on v7x verify in the trace that the "parallel" axis shards
    # across both TensorCores; switch to pltpu.CORE_PARALLEL if it does not.
    return pltpu.CompilerParams(**kwargs)


def _run_scale_2d(slab, scale, block_rows, vmem_limit_bytes, cost_estimate):
    rows, lanes = slab.shape
    grid = (pl.cdiv(rows, block_rows),)
    return pl.pallas_call(
        _scale_kernel,
        out_shape=jax.ShapeDtypeStruct(slab.shape, slab.dtype),
        grid=grid,
        in_specs=[
            # scalar parameter kept whole in SMEM for every grid step
            pl.BlockSpec(memory_space=pltpu.MemorySpace.SMEM),
            # large lane-dense input block; ragged last row-block is masked
            pl.BlockSpec((block_rows, lanes), lambda i: (i, 0)),
        ],
        out_specs=pl.BlockSpec((block_rows, lanes), lambda i: (i, 0)),
        compiler_params=_compiler_params(vmem_limit_bytes),
        cost_estimate=cost_estimate,
    )(scale, slab)


def _run_scale_1d(flat, scale, block_elems, vmem_limit_bytes, cost_estimate):
    n = flat.shape[0]
    grid = (pl.cdiv(n, block_elems),)
    return pl.pallas_call(
        _scale_kernel,
        out_shape=jax.ShapeDtypeStruct(flat.shape, flat.dtype),
        grid=grid,
        in_specs=[
            pl.BlockSpec(memory_space=pltpu.MemorySpace.SMEM),
            # 128-multiple (or full-array) block; partial tail block is masked
            pl.BlockSpec((block_elems,), lambda i: (i,)),
        ],
        out_specs=pl.BlockSpec((block_elems,), lambda i: (i,)),
        compiler_params=_compiler_params(vmem_limit_bytes),
        cost_estimate=cost_estimate,
    )(scale, flat)


def _pick_lanes(n: int):
    """Widest lane count (multiple of 128) that divides n, or None."""
    for cand in (2048, 1024, 512, 256, 128):
        if n % cand == 0:
            return cand
    return None


def scale_forward(x: jax.Array, scale: jax.Array) -> jax.Array:
    """Elementwise multiply of `x` (any shape, e.g. NCHW) by scalar `scale`."""
    orig_shape = x.shape
    dtype = x.dtype
    itemsize = jnp.dtype(dtype).itemsize
    # dtype-aware sublane multiple (packed sublanes for sub-32-bit dtypes)
    sub_mult = {4: 8, 2: 16, 1: 32}.get(itemsize, 8)

    n = x.size
    if n == 0:
        return x

    # Scalar parameter lives in SMEM as a (1,) float32 vector.
    scale = jnp.asarray(scale, dtype=jnp.float32).reshape(1)

    target_block_bytes, vmem_limit_bytes = _device_budget()
    cost = pl.CostEstimate(
        flops=int(n), transcendentals=0, bytes_accessed=2 * int(n) * itemsize
    )

    flat = x.reshape(-1)
    lanes = _pick_lanes(n)

    if lanes is not None:
        # Bulk path: reinterpret as a lane-dense (rows, lanes) slab; no copies.
        slab = flat.reshape(n // lanes, lanes)
        rows = slab.shape[0]
        raw_rows = max(1, target_block_bytes // (lanes * itemsize))
        block_rows = max(sub_mult, (raw_rows // sub_mult) * sub_mult)
        if rows <= block_rows:
            block_rows = rows  # block dim equal to full array dim is legal
        out_slab = _run_scale_2d(slab, scale, block_rows, vmem_limit_bytes, cost)
        return out_slab.reshape(orig_shape)

    # Ragged path (n % 128 != 0): run directly on the flat 1-D array; Pallas
    # boundary masking handles the single partial last block.  No jnp.pad
    # copy before the kernel and no [:n] un-pad slice after it.
    chunk = sub_mult * 128
    block_elems = max(chunk, ((target_block_bytes // itemsize) // chunk) * chunk)
    if n < chunk:
        block_elems = n  # full-array block is always legal
    else:
        block_elems = min(block_elems, (n // chunk) * chunk)
    out_flat = _run_scale_1d(flat, scale, block_elems, vmem_limit_bytes, cost)
    return out_flat.reshape(orig_shape)


if __name__ == "__main__":
    key = jax.random.PRNGKey(0)

    # Learnable scalar, mirroring nn.Parameter(torch.FloatTensor([1.0])),
    # perturbed deterministically so the multiply is non-trivial.
    scale_param = jnp.asarray([1.0], dtype=jnp.float32) * jnp.float32(1.5)

    # Small NCHW input consistent with how Scale is used in the RPN head.
    x = jax.random.normal(key, (2, 4, 16, 16), dtype=jnp.float32)
    y = jax.block_until_ready(scale_forward(x, scale_param))
    ref = x * scale_param[0]
    assert y.shape == x.shape and y.dtype == x.dtype
    assert jnp.allclose(y, ref, atol=1e-6, rtol=1e-6)

    # Ragged-size path (n % 128 != 0) -> 1-D blocked grid with masked tail.
    x2 = jax.random.normal(jax.random.PRNGKey(0), (5, 300), dtype=jnp.float32)
    y2 = jax.block_until_ready(scale_forward(x2, scale_param))
    assert y2.shape == x2.shape and y2.dtype == x2.dtype
    assert jnp.allclose(y2, x2 * scale_param[0], atol=1e-6, rtol=1e-6)

    print("KERNEL_OK")
</pallas_src>

<mosaic_0001>
module attributes {stable_mosaic.version = 11 : i64} {
  func.func @_scale_kernel(%arg0: i32, %arg1: memref<1xf32, #tpu.memory_space<smem>>, %arg2: memref<1x2048xf32, #tpu.memory_space<vmem>>, %arg3: memref<1x2048xf32, #tpu.memory_space<vmem>>) attributes {dimension_semantics = [#tpu.dimension_semantics<parallel>], iteration_bounds = array<i64: 1>, scalar_prefetch = 0 : i64, scratch_operands = 0 : i64, tpu.core_type = #tpu.core_type<tc>, window_params = [{transform_indices = @transform_0, window_bounds = array<i64: 1>}, {transform_indices = @transform_1, window_bounds = array<i64: 1, 2048>}, {transform_indices = @transform_2, window_bounds = array<i64: 1, 2048>}]} {
    %c0 = arith.constant 0 : index
    %c0_0 = arith.constant 0 : index
    %0 = vector.load %arg2[%c0, %c0_0] : memref<1x2048xf32, #tpu.memory_space<vmem>>, vector<1x2048xf32>
    %c0_1 = arith.constant 0 : index
    %1 = memref.load %arg1[%c0_1] : memref<1xf32, #tpu.memory_space<smem>>
    %2 = vector.broadcast %1 : f32 to vector<1x2048xf32>
    %3 = arith.mulf %0, %2 : vector<1x2048xf32>
    %c0_2 = arith.constant 0 : index
    %c0_3 = arith.constant 0 : index
    %4 = vector.load %arg3[%c0_2, %c0_3] : memref<1x2048xf32, #tpu.memory_space<vmem>>, vector<1x2048xf32>
    tpu.vector_store %arg3[%c0_2, %c0_3], %3 {strides = array<i32>} : memref<1x2048xf32, #tpu.memory_space<vmem>>, vector<1x2048xf32>,
    return
  }
  func.func @transform_0(%arg0: i32) -> i32 {
    %c0_i32 = arith.constant 0 : i32
    %c0_i32_0 = arith.constant 0 : i32
    return %c0_i32 : i32
  }
  func.func @transform_1(%arg0: i32) -> (i32, i32) {
    %c0_i32 = arith.constant 0 : i32
    %c0_i32_0 = arith.constant 0 : i32
    return %arg0, %c0_i32 : i32, i32
  }
  func.func @transform_2(%arg0: i32) -> (i32, i32) {
    %c0_i32 = arith.constant 0 : i32
    %c0_i32_0 = arith.constant 0 : i32
    return %arg0, %c0_i32 : i32, i32
  }
}

</mosaic_0001>

<bundles_post_ra>
// kernel: tpu_custom_call.1
= control target key start
LH: loop header
LB: loop body
LE: loop exit
PB: predicated region body
PF: predicated region fallthrough
CT: control target
= control target key end

     0   :  { %8 = vsyncpa [#allocation4], 0  ;;  %s142_s0 = inlined_call_operand.<no memory space> [shape: f32[1], index: 0, kind: input, shape index: {}]   ;;  %s143_s1 = inlined_call_operand.hbm [shape: f32[1,2048], index: 1, kind: input, shape index: {}]   ;;  %s144_s2 = inlined_call_operand.hbm [shape: f32[1,2048], index: 2, kind: output, shape index: {}]  }
   0x1   :  { %9 = vsyncpa [#allocation5], 0  ;;  %s98_s9 = smov [#allocation3]   ;;  %s50_s13 = scalar_lea.hbm %s143_s1, 256 }
   0x2   :  { %s18_s10 = sshll.u32 %s98_s9, 4  ;;  %p51_p0 = scmp.ne.s32.totalorder %s143_s1, %s50_s13  ;;  %s19_s10 = int_to_ptr.vmem [resolvable:$true] %s18_s10 }
   0x3   :  { %p54_p1 = scmp.lt.u32.totalorder %s50_s13, %s143_s1 }
   0x5   :  { %p56_p2 = pnand %p54_p1, %p51_p0 }
   0x7   :  { %59 = shalt.err (!%p56_p2)
}
   0x8   :  { %s60_s18 = scalar_lea.vmem %s19_s10, 256  ;;  %p65_p4 = scmp.lt.s32.totalorder %s19_s10, %s19_s10 }
   0x9   :  { %p61_p3 = scmp.ne.s32.totalorder %s19_s10, %s60_s18  ;;  %p66_p5 = scmp.lt.s32.totalorder %s60_s18, %s60_s18 }
   0xb   :  { %p67_p6 = por %p66_p5, %p65_p4 }
   0xd   :  { %p68_p7 = pnand %p67_p6, %p61_p3 }
   0xf   :  { %71 = shalt.err (!%p68_p7)
}
  0x10   :  { %21 = dma.hbm_to_vmem [thread:$0]  %s143_s1, 256, %s19_s10, [#allocation4]  }
  0x11   :  { %94 = dma.done.wait [#allocation4], 256  }
  0x12   :  { %95 = vsyncadd [#allocation4], 4294967040  ;;  %v28_v0 = vstv %s142_s0  ;;  %s99_s23 = smov [#allocation6]   ;;  %v25_v1 = vld [vmem:[#allocation3] sm:$0xff]  ;;  %v26_v2 = vld [vmem:[#allocation3 + $0x8] sm:$0xff] }
  0x13   :  { %s39_s24 = sshll.u32 %s99_s23, 4  ;;  %v29_v3 = vmul.f32 %v28_v0, %v25_v1  ;;  %v30_v4 = vmul.f32 %v28_v0, %v26_v2  ;;  %s40_s24 = int_to_ptr.vmem [resolvable:$true] %s39_s24 }
  0x14   :  { %s72_s25 = scalar_lea.vmem %s40_s24, 256  ;;  %p77_p9 = scmp.lt.s32.totalorder %s40_s24, %s40_s24 }
  0x15   :  { %31 = vst [vmem:[#allocation6] sm:$0xff] %v29_v3  ;;  %32 = vst [vmem:[#allocation6 + $0x8] sm:$0xff] %v30_v4  ;;  %p73_p8 = scmp.ne.s32.totalorder %s40_s24, %s72_s25  ;;  %p78_p10 = scmp.lt.s32.totalorder %s72_s25, %s72_s25 }
  0x17   :  { %p79_p11 = por %p78_p10, %p77_p9 }
  0x19   :  { %p80_p12 = pnand %p79_p11, %p73_p8 }
  0x1b   :  { %83 = shalt.err (!%p80_p12)
}
  0x1c   :  { %s84_s0 = scalar_lea.hbm %s144_s2, 256 }
  0x1d   :  { %p85_p13 = scmp.ne.s32.totalorder %s144_s2, %s84_s0  ;;  %p88_p0 = scmp.lt.u32.totalorder %s84_s0, %s144_s2 }
  0x1f   :  { %p90_p1 = pnand %p88_p0, %p85_p13 }
  0x21   :  { %93 = shalt.err (!%p90_p1)
}
  0x22   :  { %42 = dma.vmem_to_hbm [thread:$0]  %s40_s24, 256, %s144_s2, [#allocation5]  }
  0x23   :  { %96 = dma.done.wait [#allocation5], 256  }
  0x24   :  { %97 = vsyncadd [#allocation5], 4294967040 }
  0x25   :  { %46 = vsyncpa [#allocation4], 1 }
  0x26   :  { %47 = vsyncpa [#allocation5], 1 }

</bundles_post_ra>
